<compile_context>
chip_gen: v7x
topology: tpu7x:2x2x1
jax: 0.10.0
libtpu: 0.0.40
codegen_flags: <defaults>
</compile_context>

<pallas_src>
import jax
import jax.numpy as jnp
from jax.experimental import pallas as pl


def _fused_gat_kernel(heads1: int):
    def kernel(x_ref, w1_ref, asrc1_ref, adst1_ref, hmask_ref, b1_ref,
               w2_ref, asrc2_ref, adst2_ref, b2_ref, adjb_ref, out_ref):
        adj_bias = adjb_ref[...]                                   # [N, N] additive mask (0 / -1e30)

        def attend(feat, a_src_col, a_dst_col):
            # feat: [N, F]; a_*_col: [F, 1] -> neighbor-restricted softmax attention [N, N]
            e_src = jnp.dot(feat, a_src_col, preferred_element_type=jnp.float32)   # [N, 1]  (MXU)
            e_dst = jnp.dot(feat, a_dst_col, preferred_element_type=jnp.float32)   # [N, 1]  (MXU)
            logits = e_dst + jnp.transpose(e_src)                  # logits[i, j] = e_dst[i] + e_src[j]
            logits = jnp.where(logits >= 0, logits, 0.2 * logits)  # LeakyReLU(0.2)
            masked = logits + adj_bias                             # mask non-edges
            m = jnp.max(masked, axis=-1, keepdims=True)
            p = jnp.exp(masked - m)
            return p * pl.reciprocal(jnp.sum(p, axis=-1, keepdims=True), approx=True)

        # ---- layer 1: all heads share one full-width projection matmul ----
        h1 = jnp.dot(x_ref[...], w1_ref[...], preferred_element_type=jnp.float32)  # [N, H*hid]
        act1 = jnp.zeros_like(h1)
        for h in range(heads1):                                    # unrolled at trace time
            alpha = attend(h1, asrc1_ref[h], adst1_ref[h])         # [N, N]
            # keep only this head's column block of the concat layout
            act1 = act1 + jnp.dot(alpha, h1, preferred_element_type=jnp.float32) * hmask_ref[h]
        act1 = jnp.maximum(act1 + b1_ref[...], 0.0)                # bias + inter-layer ReLU

        # ---- layer 2: single head, concat=False (mean over one head == identity) ----
        h2 = jnp.dot(act1, w2_ref[...], preferred_element_type=jnp.float32)        # [N, out]
        alpha2 = attend(h2, asrc2_ref[...], adst2_ref[...])
        out = jnp.dot(alpha2, h2, preferred_element_type=jnp.float32) + b2_ref[...]
        out_ref[...] = out.astype(out_ref.dtype)

    return kernel


def gat_forward(params, x, adj):
    """Fused 2-layer GAT forward. x: [N, F_in], adj: [N, N] 0/1 mask (incl. self loops)."""
    N, _ = x.shape
    H1, hid = params["asrc1"].shape
    HF = H1 * hid
    out_dim = params["w2"].shape[1]

    eye = jnp.eye(H1, dtype=jnp.float32)
    # Per-head attention vectors embedded as [HF, 1] columns (zero outside the head's block),
    # so e_src/e_dst become plain matmuls against the shared [N, HF] projection.
    asrc1 = (eye[:, :, None] * params["asrc1"][None, :, :]).reshape(H1, HF, 1)
    adst1 = (eye[:, :, None] * params["adst1"][None, :, :]).reshape(H1, HF, 1)
    # Block one-hot selector [H1, 1, HF] for writing head h's slice of the concat layout.
    hmask = jnp.repeat(eye, hid, axis=1).reshape(H1, 1, HF)
    b1 = params["b1"].reshape(1, HF)
    asrc2 = params["asrc2"].reshape(out_dim, 1)
    adst2 = params["adst2"].reshape(out_dim, 1)
    b2 = params["b2"].reshape(1, out_dim)
    # Precomputed additive mask: 0 on edges (incl. self-loops), -1e30 elsewhere.
    adj_bias = jnp.where(adj > 0, 0.0, -1e30).astype(jnp.float32)

    return pl.pallas_call(
        _fused_gat_kernel(H1),
        out_shape=jax.ShapeDtypeStruct((N, out_dim), jnp.float32),
    )(x, params["w1"], asrc1, adst1, hmask, b1, params["w2"], asrc2, adst2, b2, adj_bias)


# -------------------- pure-JAX reference (for correctness check) --------------------
def _gat_conv_ref(x, w, att_src, att_dst, bias, adj, heads, concat, apply_relu):
    N = x.shape[0]
    F_out = w.shape[1] // heads
    h = (x @ w).reshape(N, heads, F_out)
    e_src = jnp.einsum("nhf,hf->nh", h, att_src.reshape(heads, F_out))
    e_dst = jnp.einsum("nhf,hf->nh", h, att_dst.reshape(heads, F_out))
    logits = e_dst[:, None, :] + e_src[None, :, :]
    logits = jnp.where(logits >= 0, logits, 0.2 * logits)
    masked = jnp.where(adj[:, :, None] > 0, logits, -1e30)
    alpha = jax.nn.softmax(masked, axis=1)
    out = jnp.einsum("ijh,jhf->ihf", alpha, h)
    out = out.reshape(N, heads * F_out) + bias if concat else out.mean(axis=1) + bias
    return jnp.maximum(out, 0.0) if apply_relu else out


def _gat_forward_ref(params, x, adj):
    h = _gat_conv_ref(x, params["w1"], params["asrc1"], params["adst1"], params["b1"], adj,
                      4, True, True)
    return _gat_conv_ref(h, params["w2"], params["asrc2"], params["adst2"], params["b2"], adj,
                         1, False, False)


if __name__ == "__main__":
    N = 16            # nodes
    input_dim = 8
    hidden_dim = 8
    output_dim = 4
    heads1 = 4
    E = 40            # edges

    key = jax.random.PRNGKey(0)
    ks = jax.random.split(key, 10)

    # Deterministic parameter init (glorot-ish scale), matching PyG GATConv shapes.
    params = {
        "w1": jax.random.normal(ks[0], (input_dim, heads1 * hidden_dim), jnp.float32) * 0.3,
        "asrc1": jax.random.normal(ks[1], (heads1, hidden_dim), jnp.float32) * 0.3,
        "adst1": jax.random.normal(ks[2], (heads1, hidden_dim), jnp.float32) * 0.3,
        "b1": jax.random.normal(ks[3], (heads1 * hidden_dim,), jnp.float32) * 0.1,
        "w2": jax.random.normal(ks[4], (heads1 * hidden_dim, output_dim), jnp.float32) * 0.2,
        "asrc2": jax.random.normal(ks[5], (1, output_dim), jnp.float32) * 0.3,
        "adst2": jax.random.normal(ks[6], (1, output_dim), jnp.float32) * 0.3,
        "b2": jax.random.normal(ks[7], (output_dim,), jnp.float32) * 0.1,
    }

    # Node features and random edge_index (source row 0, target row 1), COO like PyG.
    x = jax.random.normal(ks[8], (N, input_dim), jnp.float32)
    src = jax.random.randint(jax.random.fold_in(ks[9], 0), (E,), 0, N)
    dst = jax.random.randint(jax.random.fold_in(ks[9], 1), (E,), 0, N)
    edge_index = jnp.stack([src, dst])  # [2, E]

    # Dense adjacency mask adj[i, j] = 1 if edge j -> i; self-loops added (GATConv default).
    adj = jnp.zeros((N, N), jnp.float32).at[edge_index[1], edge_index[0]].set(1.0)
    adj = adj.at[jnp.arange(N), jnp.arange(N)].set(1.0)

    fwd = jax.jit(gat_forward)
    out = jax.block_until_ready(fwd(params, x, adj))
    ref = jax.block_until_ready(_gat_forward_ref(params, x, adj))
    assert out.shape == (N, output_dim)
    assert jnp.allclose(out, ref, atol=1e-2, rtol=1e-2)
    print("KERNEL_OK")
</pallas_src>

<mosaic_0001>
module attributes {stable_mosaic.version = 11 : i64} {
  func.func @kernel(%arg0: memref<16x8xf32, #tpu.memory_space<vmem>>, %arg1: memref<8x32xf32, #tpu.memory_space<vmem>>, %arg2: memref<4x32x1xf32, #tpu.memory_space<vmem>>, %arg3: memref<4x32x1xf32, #tpu.memory_space<vmem>>, %arg4: memref<4x1x32xf32, #tpu.memory_space<vmem>>, %arg5: memref<1x32xf32, #tpu.memory_space<vmem>>, %arg6: memref<32x4xf32, #tpu.memory_space<vmem>>, %arg7: memref<4x1xf32, #tpu.memory_space<vmem>>, %arg8: memref<4x1xf32, #tpu.memory_space<vmem>>, %arg9: memref<1x4xf32, #tpu.memory_space<vmem>>, %arg10: memref<16x16xf32, #tpu.memory_space<vmem>>, %arg11: memref<16x4xf32, #tpu.memory_space<vmem>>) attributes {dimension_semantics = [], scalar_prefetch = 0 : i64, scratch_operands = 0 : i64, tpu.core_type = #tpu.core_type<tc>} {
    %c0 = arith.constant 0 : index
    %c0_0 = arith.constant 0 : index
    %0 = vector.load %arg10[%c0, %c0_0] : memref<16x16xf32, #tpu.memory_space<vmem>>, vector<16x16xf32>
    %c0_1 = arith.constant 0 : index
    %c0_2 = arith.constant 0 : index
    %1 = vector.load %arg0[%c0_1, %c0_2] : memref<16x8xf32, #tpu.memory_space<vmem>>, vector<16x8xf32>
    %c0_3 = arith.constant 0 : index
    %c0_4 = arith.constant 0 : index
    %2 = vector.load %arg1[%c0_3, %c0_4] : memref<8x32xf32, #tpu.memory_space<vmem>>, vector<8x32xf32>
    %cst = arith.constant dense<0.000000e+00> : vector<16x32xf32>
    %3 = tpu.matmul %1, %2, %cst {dimension_numbers = #tpu.dot_dimension_numbers<[1], [0], [0], [1], [0, 0, 1, 1], [], []>} : vector<16x8xf32>, vector<8x32xf32>, vector<16x32xf32> -> vector<16x32xf32>
    %cst_5 = arith.constant 0.000000e+00 : f32
    %4 = vector.broadcast %cst_5 : f32 to vector<16x32xf32>
    %c0_6 = arith.constant 0 : index
    %c0_7 = arith.constant 0 : index
    %c0_8 = arith.constant 0 : index
    %5 = vector.load %arg2[%c0_6, %c0_7, %c0_8] : memref<4x32x1xf32, #tpu.memory_space<vmem>>, vector<1x32x1xf32>
    %6 = vector.shape_cast %5 : vector<1x32x1xf32> to vector<32x1xf32>
    %c0_9 = arith.constant 0 : index
    %c0_10 = arith.constant 0 : index
    %c0_11 = arith.constant 0 : index
    %7 = vector.load %arg3[%c0_9, %c0_10, %c0_11] : memref<4x32x1xf32, #tpu.memory_space<vmem>>, vector<1x32x1xf32>
    %8 = vector.shape_cast %7 : vector<1x32x1xf32> to vector<32x1xf32>
    %cst_12 = arith.constant dense<0.000000e+00> : vector<16x1xf32>
    %9 = tpu.matmul %3, %6, %cst_12 {dimension_numbers = #tpu.dot_dimension_numbers<[1], [0], [0], [1], [0, 0, 1, 1], [], []>} : vector<16x32xf32>, vector<32x1xf32>, vector<16x1xf32> -> vector<16x1xf32>
    %cst_13 = arith.constant dense<0.000000e+00> : vector<16x1xf32>
    %10 = tpu.matmul %3, %8, %cst_13 {dimension_numbers = #tpu.dot_dimension_numbers<[1], [0], [0], [1], [0, 0, 1, 1], [], []>} : vector<16x32xf32>, vector<32x1xf32>, vector<16x1xf32> -> vector<16x1xf32>
    %11 = tpu.transpose %9, [1, 0] : vector<16x1xf32> -> vector<1x16xf32>
    %12 = vector.broadcast %10 : vector<16x1xf32> to vector<16x16xf32>
    %13 = vector.broadcast %11 : vector<1x16xf32> to vector<16x16xf32>
    %14 = arith.addf %12, %13 : vector<16x16xf32>
    %cst_14 = arith.constant 0.000000e+00 : f32
    %15 = vector.broadcast %cst_14 : f32 to vector<16x16xf32>
    %16 = arith.cmpf oge, %14, %15 : vector<16x16xf32>
    %cst_15 = arith.constant 2.000000e-01 : f32
    %17 = vector.broadcast %cst_15 : f32 to vector<16x16xf32>
    %18 = arith.mulf %17, %14 : vector<16x16xf32>
    %19 = arith.select %16, %14, %18 : vector<16x16xi1>, vector<16x16xf32>
    %20 = arith.addf %19, %0 : vector<16x16xf32>
    %cst_16 = arith.constant dense<0xFF800000> : vector<16xf32>
    %21 = vector.multi_reduction <maximumf>, %20, %cst_16 [1] : vector<16x16xf32> to vector<16xf32>
    %22 = vector.shape_cast %21 : vector<16xf32> to vector<16x1xf32>
    %23 = vector.broadcast %22 : vector<16x1xf32> to vector<16x16xf32>
    %24 = arith.subf %20, %23 : vector<16x16xf32>
    %25 = math.exp %24 : vector<16x16xf32>
    %cst_17 = arith.constant dense<0.000000e+00> : vector<16xf32>
    %26 = vector.multi_reduction <add>, %25, %cst_17 [1] : vector<16x16xf32> to vector<16xf32>
    %27 = vector.shape_cast %26 : vector<16xf32> to vector<16x1xf32>
    %28 = tpu.reciprocal %27 {approx = true} : vector<16x1xf32> -> vector<16x1xf32>
    %29 = vector.broadcast %28 : vector<16x1xf32> to vector<16x16xf32>
    %30 = arith.mulf %25, %29 : vector<16x16xf32>
    %cst_18 = arith.constant dense<0.000000e+00> : vector<16x32xf32>
    %31 = tpu.matmul %30, %3, %cst_18 {dimension_numbers = #tpu.dot_dimension_numbers<[1], [0], [0], [1], [0, 0, 1, 1], [], []>} : vector<16x16xf32>, vector<16x32xf32>, vector<16x32xf32> -> vector<16x32xf32>
    %c0_19 = arith.constant 0 : index
    %c0_20 = arith.constant 0 : index
    %c0_21 = arith.constant 0 : index
    %32 = vector.load %arg4[%c0_19, %c0_20, %c0_21] : memref<4x1x32xf32, #tpu.memory_space<vmem>>, vector<1x1x32xf32>
    %33 = vector.shape_cast %32 : vector<1x1x32xf32> to vector<1x32xf32>
    %34 = vector.broadcast %33 : vector<1x32xf32> to vector<16x32xf32>
    %35 = arith.mulf %31, %34 : vector<16x32xf32>
    %36 = arith.addf %4, %35 : vector<16x32xf32>
    %c1 = arith.constant 1 : index
    %c0_22 = arith.constant 0 : index
    %c0_23 = arith.constant 0 : index
    %37 = vector.load %arg2[%c1, %c0_22, %c0_23] : memref<4x32x1xf32, #tpu.memory_space<vmem>>, vector<1x32x1xf32>
    %38 = vector.shape_cast %37 : vector<1x32x1xf32> to vector<32x1xf32>
    %c1_24 = arith.constant 1 : index
    %c0_25 = arith.constant 0 : index
    %c0_26 = arith.constant 0 : index
    %39 = vector.load %arg3[%c1_24, %c0_25, %c0_26] : memref<4x32x1xf32, #tpu.memory_space<vmem>>, vector<1x32x1xf32>
    %40 = vector.shape_cast %39 : vector<1x32x1xf32> to vector<32x1xf32>
    %cst_27 = arith.constant dense<0.000000e+00> : vector<16x1xf32>
    %41 = tpu.matmul %3, %38, %cst_27 {dimension_numbers = #tpu.dot_dimension_numbers<[1], [0], [0], [1], [0, 0, 1, 1], [], []>} : vector<16x32xf32>, vector<32x1xf32>, vector<16x1xf32> -> vector<16x1xf32>
    %cst_28 = arith.constant dense<0.000000e+00> : vector<16x1xf32>
    %42 = tpu.matmul %3, %40, %cst_28 {dimension_numbers = #tpu.dot_dimension_numbers<[1], [0], [0], [1], [0, 0, 1, 1], [], []>} : vector<16x32xf32>, vector<32x1xf32>, vector<16x1xf32> -> vector<16x1xf32>
    %43 = tpu.transpose %41, [1, 0] : vector<16x1xf32> -> vector<1x16xf32>
    %44 = vector.broadcast %42 : vector<16x1xf32> to vector<16x16xf32>
    %45 = vector.broadcast %43 : vector<1x16xf32> to vector<16x16xf32>
    %46 = arith.addf %44, %45 : vector<16x16xf32>
    %cst_29 = arith.constant 0.000000e+00 : f32
    %47 = vector.broadcast %cst_29 : f32 to vector<16x16xf32>
    %48 = arith.cmpf oge, %46, %47 : vector<16x16xf32>
    %cst_30 = arith.constant 2.000000e-01 : f32
    %49 = vector.broadcast %cst_30 : f32 to vector<16x16xf32>
    %50 = arith.mulf %49, %46 : vector<16x16xf32>
    %51 = arith.select %48, %46, %50 : vector<16x16xi1>, vector<16x16xf32>
    %52 = arith.addf %51, %0 : vector<16x16xf32>
    %cst_31 = arith.constant dense<0xFF800000> : vector<16xf32>
    %53 = vector.multi_reduction <maximumf>, %52, %cst_31 [1] : vector<16x16xf32> to vector<16xf32>
    %54 = vector.shape_cast %53 : vector<16xf32> to vector<16x1xf32>
    %55 = vector.broadcast %54 : vector<16x1xf32> to vector<16x16xf32>
    %56 = arith.subf %52, %55 : vector<16x16xf32>
    %57 = math.exp %56 : vector<16x16xf32>
    %cst_32 = arith.constant dense<0.000000e+00> : vector<16xf32>
    %58 = vector.multi_reduction <add>, %57, %cst_32 [1] : vector<16x16xf32> to vector<16xf32>
    %59 = vector.shape_cast %58 : vector<16xf32> to vector<16x1xf32>
    %60 = tpu.reciprocal %59 {approx = true} : vector<16x1xf32> -> vector<16x1xf32>
    %61 = vector.broadcast %60 : vector<16x1xf32> to vector<16x16xf32>
    %62 = arith.mulf %57, %61 : vector<16x16xf32>
    %cst_33 = arith.constant dense<0.000000e+00> : vector<16x32xf32>
    %63 = tpu.matmul %62, %3, %cst_33 {dimension_numbers = #tpu.dot_dimension_numbers<[1], [0], [0], [1], [0, 0, 1, 1], [], []>} : vector<16x16xf32>, vector<16x32xf32>, vector<16x32xf32> -> vector<16x32xf32>
    %c1_34 = arith.constant 1 : index
    %c0_35 = arith.constant 0 : index
    %c0_36 = arith.constant 0 : index
    %64 = vector.load %arg4[%c1_34, %c0_35, %c0_36] : memref<4x1x32xf32, #tpu.memory_space<vmem>>, vector<1x1x32xf32>
    %65 = vector.shape_cast %64 : vector<1x1x32xf32> to vector<1x32xf32>
    %66 = vector.broadcast %65 : vector<1x32xf32> to vector<16x32xf32>
    %67 = arith.mulf %63, %66 : vector<16x32xf32>
    %68 = arith.addf %36, %67 : vector<16x32xf32>
    %c2 = arith.constant 2 : index
    %c0_37 = arith.constant 0 : index
    %c0_38 = arith.constant 0 : index
    %69 = vector.load %arg2[%c2, %c0_37, %c0_38] : memref<4x32x1xf32, #tpu.memory_space<vmem>>, vector<1x32x1xf32>
    %70 = vector.shape_cast %69 : vector<1x32x1xf32> to vector<32x1xf32>
    %c2_39 = arith.constant 2 : index
    %c0_40 = arith.constant 0 : index
    %c0_41 = arith.constant 0 : index
    %71 = vector.load %arg3[%c2_39, %c0_40, %c0_41] : memref<4x32x1xf32, #tpu.memory_space<vmem>>, vector<1x32x1xf32>
    %72 = vector.shape_cast %71 : vector<1x32x1xf32> to vector<32x1xf32>
    %cst_42 = arith.constant dense<0.000000e+00> : vector<16x1xf32>
    %73 = tpu.matmul %3, %70, %cst_42 {dimension_numbers = #tpu.dot_dimension_numbers<[1], [0], [0], [1], [0, 0, 1, 1], [], []>} : vector<16x32xf32>, vector<32x1xf32>, vector<16x1xf32> -> vector<16x1xf32>
    %cst_43 = arith.constant dense<0.000000e+00> : vector<16x1xf32>
    %74 = tpu.matmul %3, %72, %cst_43 {dimension_numbers = #tpu.dot_dimension_numbers<[1], [0], [0], [1], [0, 0, 1, 1], [], []>} : vector<16x32xf32>, vector<32x1xf32>, vector<16x1xf32> -> vector<16x1xf32>
    %75 = tpu.transpose %73, [1, 0] : vector<16x1xf32> -> vector<1x16xf32>
    %76 = vector.broadcast %74 : vector<16x1xf32> to vector<16x16xf32>
    %77 = vector.broadcast %75 : vector<1x16xf32> to vector<16x16xf32>
    %78 = arith.addf %76, %77 : vector<16x16xf32>
    %cst_44 = arith.constant 0.000000e+00 : f32
    %79 = vector.broadcast %cst_44 : f32 to vector<16x16xf32>
    %80 = arith.cmpf oge, %78, %79 : vector<16x16xf32>
    %cst_45 = arith.constant 2.000000e-01 : f32
    %81 = vector.broadcast %cst_45 : f32 to vector<16x16xf32>
    %82 = arith.mulf %81, %78 : vector<16x16xf32>
    %83 = arith.select %80, %78, %82 : vector<16x16xi1>, vector<16x16xf32>
    %84 = arith.addf %83, %0 : vector<16x16xf32>
    %cst_46 = arith.constant dense<0xFF800000> : vector<16xf32>
    %85 = vector.multi_reduction <maximumf>, %84, %cst_46 [1] : vector<16x16xf32> to vector<16xf32>
    %86 = vector.shape_cast %85 : vector<16xf32> to vector<16x1xf32>
    %87 = vector.broadcast %86 : vector<16x1xf32> to vector<16x16xf32>
    %88 = arith.subf %84, %87 : vector<16x16xf32>
    %89 = math.exp %88 : vector<16x16xf32>
    %cst_47 = arith.constant dense<0.000000e+00> : vector<16xf32>
    %90 = vector.multi_reduction <add>, %89, %cst_47 [1] : vector<16x16xf32> to vector<16xf32>
    %91 = vector.shape_cast %90 : vector<16xf32> to vector<16x1xf32>
    %92 = tpu.reciprocal %91 {approx = true} : vector<16x1xf32> -> vector<16x1xf32>
    %93 = vector.broadcast %92 : vector<16x1xf32> to vector<16x16xf32>
    %94 = arith.mulf %89, %93 : vector<16x16xf32>
    %cst_48 = arith.constant dense<0.000000e+00> : vector<16x32xf32>
    %95 = tpu.matmul %94, %3, %cst_48 {dimension_numbers = #tpu.dot_dimension_numbers<[1], [0], [0], [1], [0, 0, 1, 1], [], []>} : vector<16x16xf32>, vector<16x32xf32>, vector<16x32xf32> -> vector<16x32xf32>
    %c2_49 = arith.constant 2 : index
    %c0_50 = arith.constant 0 : index
    %c0_51 = arith.constant 0 : index
    %96 = vector.load %arg4[%c2_49, %c0_50, %c0_51] : memref<4x1x32xf32, #tpu.memory_space<vmem>>, vector<1x1x32xf32>
    %97 = vector.shape_cast %96 : vector<1x1x32xf32> to vector<1x32xf32>
    %98 = vector.broadcast %97 : vector<1x32xf32> to vector<16x32xf32>
    %99 = arith.mulf %95, %98 : vector<16x32xf32>
    %100 = arith.addf %68, %99 : vector<16x32xf32>
    %c3 = arith.constant 3 : index
    %c0_52 = arith.constant 0 : index
    %c0_53 = arith.constant 0 : index
    %101 = vector.load %arg2[%c3, %c0_52, %c0_53] : memref<4x32x1xf32, #tpu.memory_space<vmem>>, vector<1x32x1xf32>
    %102 = vector.shape_cast %101 : vector<1x32x1xf32> to vector<32x1xf32>
    %c3_54 = arith.constant 3 : index
    %c0_55 = arith.constant 0 : index
    %c0_56 = arith.constant 0 : index
    %103 = vector.load %arg3[%c3_54, %c0_55, %c0_56] : memref<4x32x1xf32, #tpu.memory_space<vmem>>, vector<1x32x1xf32>
    %104 = vector.shape_cast %103 : vector<1x32x1xf32> to vector<32x1xf32>
    %cst_57 = arith.constant dense<0.000000e+00> : vector<16x1xf32>
    %105 = tpu.matmul %3, %102, %cst_57 {dimension_numbers = #tpu.dot_dimension_numbers<[1], [0], [0], [1], [0, 0, 1, 1], [], []>} : vector<16x32xf32>, vector<32x1xf32>, vector<16x1xf32> -> vector<16x1xf32>
    %cst_58 = arith.constant dense<0.000000e+00> : vector<16x1xf32>
    %106 = tpu.matmul %3, %104, %cst_58 {dimension_numbers = #tpu.dot_dimension_numbers<[1], [0], [0], [1], [0, 0, 1, 1], [], []>} : vector<16x32xf32>, vector<32x1xf32>, vector<16x1xf32> -> vector<16x1xf32>
    %107 = tpu.transpose %105, [1, 0] : vector<16x1xf32> -> vector<1x16xf32>
    %108 = vector.broadcast %106 : vector<16x1xf32> to vector<16x16xf32>
    %109 = vector.broadcast %107 : vector<1x16xf32> to vector<16x16xf32>
    %110 = arith.addf %108, %109 : vector<16x16xf32>
    %cst_59 = arith.constant 0.000000e+00 : f32
    %111 = vector.broadcast %cst_59 : f32 to vector<16x16xf32>
    %112 = arith.cmpf oge, %110, %111 : vector<16x16xf32>
    %cst_60 = arith.constant 2.000000e-01 : f32
    %113 = vector.broadcast %cst_60 : f32 to vector<16x16xf32>
    %114 = arith.mulf %113, %110 : vector<16x16xf32>
    %115 = arith.select %112, %110, %114 : vector<16x16xi1>, vector<16x16xf32>
    %116 = arith.addf %115, %0 : vector<16x16xf32>
    %cst_61 = arith.constant dense<0xFF800000> : vector<16xf32>
    %117 = vector.multi_reduction <maximumf>, %116, %cst_61 [1] : vector<16x16xf32> to vector<16xf32>
    %118 = vector.shape_cast %117 : vector<16xf32> to vector<16x1xf32>
    %119 = vector.broadcast %118 : vector<16x1xf32> to vector<16x16xf32>
    %120 = arith.subf %116, %119 : vector<16x16xf32>
    %121 = math.exp %120 : vector<16x16xf32>
    %cst_62 = arith.constant dense<0.000000e+00> : vector<16xf32>
    %122 = vector.multi_reduction <add>, %121, %cst_62 [1] : vector<16x16xf32> to vector<16xf32>
    %123 = vector.shape_cast %122 : vector<16xf32> to vector<16x1xf32>
    %124 = tpu.reciprocal %123 {approx = true} : vector<16x1xf32> -> vector<16x1xf32>
    %125 = vector.broadcast %124 : vector<16x1xf32> to vector<16x16xf32>
    %126 = arith.mulf %121, %125 : vector<16x16xf32>
    %cst_63 = arith.constant dense<0.000000e+00> : vector<16x32xf32>
    %127 = tpu.matmul %126, %3, %cst_63 {dimension_numbers = #tpu.dot_dimension_numbers<[1], [0], [0], [1], [0, 0, 1, 1], [], []>} : vector<16x16xf32>, vector<16x32xf32>, vector<16x32xf32> -> vector<16x32xf32>
    %c3_64 = arith.constant 3 : index
    %c0_65 = arith.constant 0 : index
    %c0_66 = arith.constant 0 : index
    %128 = vector.load %arg4[%c3_64, %c0_65, %c0_66] : memref<4x1x32xf32, #tpu.memory_space<vmem>>, vector<1x1x32xf32>
    %129 = vector.shape_cast %128 : vector<1x1x32xf32> to vector<1x32xf32>
    %130 = vector.broadcast %129 : vector<1x32xf32> to vector<16x32xf32>
    %131 = arith.mulf %127, %130 : vector<16x32xf32>
    %132 = arith.addf %100, %131 : vector<16x32xf32>
    %c0_67 = arith.constant 0 : index
    %c0_68 = arith.constant 0 : index
    %133 = vector.load %arg5[%c0_67, %c0_68] : memref<1x32xf32, #tpu.memory_space<vmem>>, vector<1x32xf32>
    %134 = vector.broadcast %133 : vector<1x32xf32> to vector<16x32xf32>
    %135 = arith.addf %132, %134 : vector<16x32xf32>
    %cst_69 = arith.constant 0.000000e+00 : f32
    %136 = vector.broadcast %cst_69 : f32 to vector<16x32xf32>
    %137 = arith.maximumf %135, %136 : vector<16x32xf32>
    %c0_70 = arith.constant 0 : index
    %c0_71 = arith.constant 0 : index
    %138 = vector.load %arg6[%c0_70, %c0_71] : memref<32x4xf32, #tpu.memory_space<vmem>>, vector<32x4xf32>
    %cst_72 = arith.constant dense<0.000000e+00> : vector<16x4xf32>
    %139 = tpu.matmul %137, %138, %cst_72 {dimension_numbers = #tpu.dot_dimension_numbers<[1], [0], [0], [1], [0, 0, 1, 1], [], []>} : vector<16x32xf32>, vector<32x4xf32>, vector<16x4xf32> -> vector<16x4xf32>
    %c0_73 = arith.constant 0 : index
    %c0_74 = arith.constant 0 : index
    %140 = vector.load %arg7[%c0_73, %c0_74] : memref<4x1xf32, #tpu.memory_space<vmem>>, vector<4x1xf32>
    %c0_75 = arith.constant 0 : index
    %c0_76 = arith.constant 0 : index
    %141 = vector.load %arg8[%c0_75, %c0_76] : memref<4x1xf32, #tpu.memory_space<vmem>>, vector<4x1xf32>
    %cst_77 = arith.constant dense<0.000000e+00> : vector<16x1xf32>
    %142 = tpu.matmul %139, %140, %cst_77 {dimension_numbers = #tpu.dot_dimension_numbers<[1], [0], [0], [1], [0, 0, 1, 1], [], []>} : vector<16x4xf32>, vector<4x1xf32>, vector<16x1xf32> -> vector<16x1xf32>
    %cst_78 = arith.constant dense<0.000000e+00> : vector<16x1xf32>
    %143 = tpu.matmul %139, %141, %cst_78 {dimension_numbers = #tpu.dot_dimension_numbers<[1], [0], [0], [1], [0, 0, 1, 1], [], []>} : vector<16x4xf32>, vector<4x1xf32>, vector<16x1xf32> -> vector<16x1xf32>
    %144 = tpu.transpose %142, [1, 0] : vector<16x1xf32> -> vector<1x16xf32>
    %145 = vector.broadcast %143 : vector<16x1xf32> to vector<16x16xf32>
    %146 = vector.broadcast %144 : vector<1x16xf32> to vector<16x16xf32>
    %147 = arith.addf %145, %146 : vector<16x16xf32>
    %cst_79 = arith.constant 0.000000e+00 : f32
    %148 = vector.broadcast %cst_79 : f32 to vector<16x16xf32>
    %149 = arith.cmpf oge, %147, %148 : vector<16x16xf32>
    %cst_80 = arith.constant 2.000000e-01 : f32
    %150 = vector.broadcast %cst_80 : f32 to vector<16x16xf32>
    %151 = arith.mulf %150, %147 : vector<16x16xf32>
    %152 = arith.select %149, %147, %151 : vector<16x16xi1>, vector<16x16xf32>
    %153 = arith.addf %152, %0 : vector<16x16xf32>
    %cst_81 = arith.constant dense<0xFF800000> : vector<16xf32>
    %154 = vector.multi_reduction <maximumf>, %153, %cst_81 [1] : vector<16x16xf32> to vector<16xf32>
    %155 = vector.shape_cast %154 : vector<16xf32> to vector<16x1xf32>
    %156 = vector.broadcast %155 : vector<16x1xf32> to vector<16x16xf32>
    %157 = arith.subf %153, %156 : vector<16x16xf32>
    %158 = math.exp %157 : vector<16x16xf32>
    %cst_82 = arith.constant dense<0.000000e+00> : vector<16xf32>
    %159 = vector.multi_reduction <add>, %158, %cst_82 [1] : vector<16x16xf32> to vector<16xf32>
    %160 = vector.shape_cast %159 : vector<16xf32> to vector<16x1xf32>
    %161 = tpu.reciprocal %160 {approx = true} : vector<16x1xf32> -> vector<16x1xf32>
    %162 = vector.broadcast %161 : vector<16x1xf32> to vector<16x16xf32>
    %163 = arith.mulf %158, %162 : vector<16x16xf32>
    %cst_83 = arith.constant dense<0.000000e+00> : vector<16x4xf32>
    %164 = tpu.matmul %163, %139, %cst_83 {dimension_numbers = #tpu.dot_dimension_numbers<[1], [0], [0], [1], [0, 0, 1, 1], [], []>} : vector<16x16xf32>, vector<16x4xf32>, vector<16x4xf32> -> vector<16x4xf32>
    %c0_84 = arith.constant 0 : index
    %c0_85 = arith.constant 0 : index
    %165 = vector.load %arg9[%c0_84, %c0_85] : memref<1x4xf32, #tpu.memory_space<vmem>>, vector<1x4xf32>
    %166 = vector.broadcast %165 : vector<1x4xf32> to vector<16x4xf32>
    %167 = arith.addf %164, %166 : vector<16x4xf32>
    %c0_86 = arith.constant 0 : index
    %c0_87 = arith.constant 0 : index
    %168 = vector.load %arg11[%c0_86, %c0_87] : memref<16x4xf32, #tpu.memory_space<vmem>>, vector<16x4xf32>
    tpu.vector_store %arg11[%c0_86, %c0_87], %167 {strides = array<i32>} : memref<16x4xf32, #tpu.memory_space<vmem>>, vector<16x4xf32>,
    return
  }
}

</mosaic_0001>

<bundles_post_ra>
// kernel: gat_forward.1
= control target key start
LH: loop header
LB: loop body
LE: loop exit
PB: predicated region body
PF: predicated region fallthrough
CT: control target
= control target key end

     0   :  { %vm43_vm0 = vcmask 64512   ;;  %vm133_vm1 = vcmask 261120   ;;  %v2325_v24 = vmov 0   ;;  %v332_v31 = vlaneseq  ;;  %s2688_s1 = inlined_call_operand.vmem [shape: f32[8,32], index: 1, kind: input, shape index: {}]   ;;  %s2689_s0 = inlined_call_operand.vmem [shape: f32[16,8], index: 0, kind: input, shape index: {}]   ;;  %s2690_s3 = inlined_call_operand.vmem [shape: f32[4,32,1], index: 3, kind: input, shape index: {}]   ;;  %s2691_s2 = inlined_call_operand.vmem [shape: f32[4,32,1], index: 2, kind: input, shape index: {}]   ;;  %s2692_s10 = inlined_call_operand.vmem [shape: f32[16,16], index: 10, kind: input, shape index: {}]   ;;  %s2693_s4 = inlined_call_operand.vmem [shape: f32[4,1,32], index: 4, kind: input, shape index: {}]   ;;  %s2694_s6 = inlined_call_operand.vmem [shape: f32[32,4], index: 6, kind: input, shape index: {}]   ;;  %s2695_s7 = inlined_call_operand.vmem [shape: f32[4,1], index: 7, kind: input, shape index: {}]   ;;  %s2696_s5 = inlined_call_operand.vmem [shape: f32[1,32], index: 5, kind: input, shape index: {}]   ;;  %s2697_s8 = inlined_call_operand.vmem [shape: f32[4,1], index: 8, kind: input, shape index: {}]   ;;  %s2698_s9 = inlined_call_operand.vmem [shape: f32[1,4], index: 9, kind: input, shape index: {}]   ;;  %s2699_s11 = inlined_call_operand.vmem [shape: f32[16,4], index: 11, kind: output, shape index: {}]  }
   0x1   :  { %v42_v0 = vld [vmem:[%s2688_s1] sm:$0xff]  ;;  %v41_v2 = vld [vmem:[%s2689_s0 + $0x8] sm:$0xff]  ;;  %v131_v8 = vld [vmem:[%s2690_s3 + $0x10] sm:$0xff]  ;;  %2283 = vset.pattern.permute.xlu0 %v2325_v24  ;;  %vm346_vm4 = vcmask 130048   ;;  %vm1559_vm11 = vcmask 1043456   ;;  %vm1552_vm12 = vcmask 31744  }
   0x2   :  { %v40_v1 = vld [vmem:[%s2689_s0] sm:$0xff]  ;;  %2040 = vmatprep.subr.mxu0 %v42_v0  ;;  %v130_v4 = vld [vmem:[%s2690_s3 + $0x8] sm:$0xff]  ;;  %v132_v9 = vld [vmem:[%s2690_s3 + $0x18] sm:$0xff]  ;;  %v333_v32 = vshrl.u32 %v332_v31, 7 }
   0x3   :  { %2042 = vmatprep.mubr.msk.f32.mxu0 %vm43_vm0, %v40_v1  ;;  %v129_v3 = vld [vmem:[%s2690_s3] sm:$0xff]  ;;  %2041 = vmatpush3.msra.mxu0 %v42_v0  ;;  %v126_v7 = vld [vmem:[%s2691_s2 + $0x8] sm:$0xff]  ;;  %v2201_v11 = vpack.c.bf16 %v132_v9, %v131_v8  ;;  %v127_v12 = vld [vmem:[%s2691_s2 + $0x10] sm:$0xff] }
   0x4   :  { %v125_v5 = vld [vmem:[%s2691_s2] sm:$0xff]  ;;  %v2197_v6 = vpack.c.bf16 %v130_v4, %v129_v3  ;;  %2043 = vmatmul.mubr.msk.f32.vlgmr.msra.gmra.mrb[0].mxu0 %vm43_vm0, %v41_v2  ;;  %v128_v13 = vld [vmem:[%s2691_s2 + $0x18] sm:$0xff]  ;;  %v1898_v16 = vld [vmem:[%s2691_s2 + $0x28] sm:$0xff]  ;;  %v2461_v33 = vsub.s32 0, %v333_v32 }
   0x5   :  { %v2189_v10 = vpack.c.bf16 %v126_v7, %v125_v5  ;;  %v2193_v14 = vpack.c.bf16 %v128_v13, %v127_v12  ;;  %v1897_v15 = vld [vmem:[%s2691_s2 + $0x20] sm:$0xff]  ;;  %v1899_v18 = vld [vmem:[%s2691_s2 + $0x30] sm:$0xff]  ;;  %v1900_v19 = vld [vmem:[%s2691_s2 + $0x38] sm:$0xff] }
   0x6   :  { %2198 = vmatprep.subr.bf16.mxu0 %v2197_v6  ;;  %v2209_v17 = vpack.c.bf16 %v1898_v16, %v1897_v15  ;;  %v2213_v23 = vpack.c.bf16 %v1900_v19, %v1899_v18  ;;  %v2467_v41 = vld [vmem:[%s2692_s10] sm:$0xff]  ;;  %v2472_v43 = vld [vmem:[%s2692_s10 + $0x8] sm:$0xff]  ;;  %v1903_v3 = vld [vmem:[%s2690_s3 + $0x30] sm:$0xff] }
   0x7   :  { %2190 = vmatprep.subr.bf16.mxu1 %v2189_v10  ;;  %2200 = vmatpush3.bf16.msra.mxu0 %v2197_v6  ;;  %v1901_v60 = vld [vmem:[%s2690_s3 + $0x20] sm:$0xff]  ;;  %v1902_v61 = vld [vmem:[%s2690_s3 + $0x28] sm:$0xff]  ;;  %v1904_v4 = vld [vmem:[%s2690_s3 + $0x38] sm:$0xff] }
   0x8   :  { %2192 = vmatpush3.bf16.msra.mxu1 %v2189_v10  ;;  %2202 = vmatprep.subr.bf16.mxu0 %v2201_v11  ;;  %v2217_v62 = vpack.c.bf16 %v1902_v61, %v1901_v60  ;;  %v2221_v7 = vpack.c.bf16 %v1904_v4, %v1903_v3  ;;  %v1913_v8 = vld [vmem:[%s2691_s2 + $0x40] sm:$0xff]  ;;  %v1914_v9 = vld [vmem:[%s2691_s2 + $0x48] sm:$0xff]  ;;  %v1916_v12 = vld [vmem:[%s2691_s2 + $0x58] sm:$0xff] }
   0x9   :  { %2194 = vmatprep.subr.bf16.mxu1 %v2193_v14  ;;  %v2229_v10 = vpack.c.bf16 %v1914_v9, %v1913_v8  ;;  %v1896_v4 = vld [vmem:[%s2693_s4] ss:$0 sm:$0xff] }
   0xb   :  { %2204 = vmatpush3.bf16.msra.mxu0 %v2201_v11  ;;  %v1915_v11 = vld [vmem:[%s2691_s2 + $0x50] sm:$0xff] }
   0xc   :  { %2196 = vmatpush3.bf16.msra.mxu1 %v2193_v14  ;;  %2210 = vmatprep.subr.bf16.mxu0 %v2209_v17  ;;  %v2233_v13 = vpack.c.bf16 %v1916_v12, %v1915_v11 }
  0xd7   :  { %v2433_v20 = vpop.f32.mrb[0].mxu0 }
  0xd8   :  { %v2435_v21 = vpop.f32.mrb[1].mxu0 }
  0xd9   :  { %v2439_v22 = vpack.c.bf16 %v2433_v20, %v2435_v21  ;;  %2053 = vmatprep.mubr.msk.f32.mxu1 %vm133_vm1, %v2435_v21  ;;  %2064 = vmatprep.mubr.msk.f32.mxu0 %vm133_vm1, %v2435_v21 }
  0xda   :  { %2054 = vmatmul.mubr.msk.f32.vlgmr.msra.gmra.mrb[0].mxu1 %vm133_vm1, %v2433_v20  ;;  %2065 = vmatmul.mubr.msk.f32.vlgmr.msra.gmra.mrb[2].mxu0 %vm133_vm1, %v2433_v20 }
  0xdb   :  { %2212 = vmatpush3.bf16.msra.mxu0 %v2209_v17  ;;  %2206 = vmatprep.subr.bf16.mxu1 %v2439_v22 }
  0xdc   :  { %2082 = vmatprep.mubr.msk.f32.mxu0 %vm133_vm1, %v2435_v21  ;;  %2208 = vmatpush3.bf16.msra.mxu1 %v2439_v22 }
  0xdd   :  { %2214 = vmatprep.subr.bf16.mxu0 %v2213_v23  ;;  %2218 = vmatprep.subr.bf16.mxu1 %v2217_v62 }
  0xdf   :  { %2216 = vmatpush3.bf16.msra.mxu0 %v2213_v23 }
  0xe0   :  { %2226 = vmatprep.subr.bf16.mxu0 %v2439_v22 }
  0xe2   :  { %2083 = vmatmul.mubr.msk.f32.vlgmr.msra.gmra.mrb[4].mxu0 %vm133_vm1, %v2433_v20 }
  0xe3   :  { %2228 = vmatpush3.bf16.msra.mxu0 %v2439_v22 }
 0x1ad   :  { %v2055_v25 = vpop.f32.mrb[0].mxu1  ;;  %v2066_v26 = vpop.f32.mrb[2].mxu0 }
 0x1ae   :  { %v206_v27 = vpop.f32.mrb[1].mxu1  ;;  %v281_v28 = vpop.f32.mrb[3].mxu0 }
 0x1af   :  { %324 = vperm.xlu0 %2283, %v281_v28   ;;  %290 = vxpose.xlu1.b32.start [1/2] (short) (narrow) %v206_v27, 8 }
 0x1b3   :  { %329 = vperm.xlu0 %2283, %v2066_v26   ;;  %291 = vxpose.xlu1.b32.end [2/2] (short) (narrow) %v2055_v25, 8 }
 0x1b5   :  { %v2457_v29 = vpop.f32.mrb[4].mxu0 }
 0x1b6   :  { %v2459_v30 = vpop.f32.mrb[5].mxu0 }
 0x1d1   :  { %2284 = vset.pattern.permute.xlu1 %v2325_v24 }
 0x22e   :  { %v325_v34 = vpop.permute.xlu0 %324 }
 0x22f   :  { %v306_v35 = vpop.trf.xlu1 }
 0x230   :  { %v335_v36 = vrot.slane %v306_v35, %v2461_v33 }
 0x232   :  { %v336_v37 = vadd.f32 %v335_v36, %v325_v34  ;;  %v330_v38 = vpop.permute.xlu0 %329 }
 0x233   :  { %v337_v39 = vadd.f32 %v335_v36, %v330_v38 }
 0x234   :  { %v340_v40 = vmul.f32 0.2, %v336_v37  ;;  %vm338_vm2 = vcmp.ge.f32.partialorder %v336_v37, 0.0 }
 0x235   :  { %vm339_vm3 = vcmp.ge.f32.partialorder %v337_v39, 0.0  ;;  %v341_v42 = vmul.f32 0.2, %v337_v39 }
 0x236   :  { %v342_v44 = vsel %vm338_vm2, %v336_v37, %v340_v40 }
 0x237   :  { %v344_v45 = vadd.f32 %v342_v44, %v2467_v41  ;;  %v343_v46 = vsel %vm339_vm3, %v337_v39, %v341_v42 }
 0x238   :  { %v345_v47 = vadd.f32 %v343_v46, %v2472_v43 }
 0x239   :  { %v347_v48 = vsel %vm346_vm4, %v344_v45, -inf }
 0x23a   :  { %348 = vmax.xlane.f32.xlu0 %v347_v48  ;;  %v350_v49 = vsel %vm346_vm4, %v345_v47, -inf }
 0x23b   :  { %351 = vmax.xlane.f32.xlu1 %v350_v49 }
 0x2c7   :  { %v349_v50 = vpop.xlane.xlu0 %348 }
 0x2c8   :  { %v353_v51 = vsub.f32 %v344_v45, %v349_v50  ;;  %v352_v52 = vpop.xlane.xlu1 %351  ;;  %v1917_v50 = vld [vmem:[%s2690_s3 + $0x40] sm:$0xff] }
 0x2c9   :  { %v354_v53 = vsub.f32 %v345_v47, %v352_v52 }
 0x2ca   :  { %v355_v54 = vmul.f32 1.442695, %v353_v51  ;;  %v1918_v51 = vld [vmem:[%s2690_s3 + $0x48] sm:$0xff] }
 0x2cb   :  { %v357_v55 = vmul.f32 1.442695, %v354_v53  ;;  %v2237_v52 = vpack.c.bf16 %v1918_v51, %v1917_v50 }
 0x2cc   :  { %2285 = vpow2.f32 %v355_v54 }
 0x2cd   :  { %2287 = vpow2.f32 %v357_v55  ;;  %2238 = vmatprep.subr.bf16.mxu0 %v2237_v52 }
 0x2d6   :  { %v2286_v56 = vpop.eup %2285 }
 0x2d7   :  { %v359_v57 = vsel %vm346_vm4, %v2286_v56, 0.0  ;;  %v2288_v58 = vpop.eup %2287 }
 0x2d8   :  { %360 = vadd.xlane.f32.xlu0 %v359_v57  ;;  %v362_v59 = vsel %vm346_vm4, %v2288_v58, 0.0  ;;  %v1919_v57 = vld [vmem:[%s2690_s3 + $0x50] sm:$0xff] }
 0x2dc   :  { %363 = vadd.xlane.f32.xlu0 %v362_v59 }
 0x365   :  { %v361_v63 = vpop.xlane.xlu0 %360 }
 0x366   :  { %2289 = vrcp.f32 %v361_v63  ;;  %v1930_v63 = vld [vmem:[%s2691_s2 + $0x68] sm:$0xff] }
 0x369   :  { %v364_v0 = vpop.xlane.xlu0 %363 }
 0x36a   :  { %2291 = vrcp.f32 %v364_v0 }
 0x370   :  { %v2290_v1 = vpop.eup %2289 }
 0x371   :  { %v367_v2 = vmul.f32 %v2290_v1, %v2286_v56  ;;  %v1931_v1 = vld [vmem:[%s2691_s2 + $0x70] sm:$0xff] }
 0x373   :  { %2071 = vmatprep.mubr.msk.f32.mxu1 %vm346_vm4, %v367_v2  ;;  %v1932_v2 = vld [vmem:[%s2691_s2 + $0x78] sm:$0xff] }
 0x374   :  { %v2292_v5 = vpop.eup %2291  ;;  %v2253_v3 = vpack.c.bf16 %v1932_v2, %v1931_v1 }
 0x375   :  { %v368_v6 = vmul.f32 %v2292_v5, %v2288_v58  ;;  %v1920_v58 = vld [vmem:[%s2690_s3 + $0x58] sm:$0xff]  ;;  %v1912_v5 = vld [vmem:[%s2693_s4 + $0x1] ss:$0 sm:$0xff] }
 0x376   :  { %v2241_v61 = vpack.c.bf16 %v1920_v58, %v1919_v57 }
 0x377   :  { %2072 = vmatmul.mubr.msk.f32.vlgmr.msra.gmra.mrb[2].mxu1 %vm346_vm4, %v368_v6 }
 0x378   :  { %2220 = vmatpush3.bf16.msra.mxu1 %v2217_v62  ;;  %2093 = vmatprep.mubr.msk.f32.mxu1 %vm133_vm1, %v2435_v21  ;;  %v1929_v62 = vld [vmem:[%s2691_s2 + $0x60] sm:$0xff] }
 0x379   :  { %2222 = vmatprep.subr.bf16.mxu1 %v2221_v7  ;;  %v2249_v0 = vpack.c.bf16 %v1930_v63, %v1929_v62 }
 0x37c   :  { %2224 = vmatpush3.bf16.msra.mxu1 %v2221_v7 }
 0x37d   :  { %2230 = vmatprep.subr.bf16.mxu1 %v2229_v10 }
 0x37f   :  { %2094 = vmatmul.mubr.msk.f32.vlgmr.msra.gmra.mrb[4].mxu1 %vm133_vm1, %v2433_v20 }
 0x380   :  { %2232 = vmatpush3.bf16.msra.mxu1 %v2229_v10  ;;  %2111 = vmatprep.mubr.msk.f32.mxu1 %vm133_vm1, %v2435_v21 }
 0x381   :  { %2234 = vmatprep.subr.bf16.mxu1 %v2233_v13 }
 0x384   :  { %2236 = vmatpush3.bf16.msra.mxu1 %v2233_v13 }
 0x385   :  { %2246 = vmatprep.subr.bf16.mxu1 %v2439_v22 }
 0x387   :  { %2112 = vmatmul.mubr.msk.f32.vlgmr.msra.gmra.mrb[6].mxu1 %vm133_vm1, %v2433_v20 }
 0x388   :  { %2248 = vmatpush3.bf16.msra.mxu1 %v2439_v22 }
 0x44a   :  { %v2516_v14 = vpop.f32.mrb[2].mxu1 }
 0x44b   :  { %v2518_v15 = vpop.f32.mrb[3].mxu1  ;;  %v458_v7 = vmul.f32 %v2516_v14, %v1896_v4 }
 0x44c   :  { %v457_v10 = vmul.f32 %v1896_v4, %v2518_v15 }
 0x452   :  { %v2095_v16 = vpop.f32.mrb[4].mxu1 }
 0x453   :  { %660 = vperm.xlu1 %2284, %v2095_v16   ;;  %v612_v17 = vpop.f32.mrb[5].mxu1 }
 0x454   :  { %655 = vperm.xlu0 %2283, %v612_v17  }
 0x45a   :  { %v2520_v18 = vpop.f32.mrb[6].mxu1 }
 0x45b   :  { %v2522_v19 = vpop.f32.mrb[7].mxu1 }
 0x47c   :  { %621 = vxpose.xlu1.b32.start [1/2] (short) (narrow) %v2459_v30, 8 }
 0x480   :  { %622 = vxpose.xlu1.b32.end [2/2] (short) (narrow) %v2457_v29, 8 }
 0x4d2   :  { %v661_v23 = vpop.permute.xlu1 %660 }
 0x4d3   :  { %v656_v26 = vpop.permute.xlu0 %655 }
 0x4fc   :  { %v637_v24 = vpop.trf.xlu1 }
 0x4fd   :  { %v666_v25 = vrot.slane %v637_v24, %v2461_v33 }
 0x4ff   :  { %v667_v27 = vadd.f32 %v666_v25, %v656_v26  ;;  %v668_v28 = vadd.f32 %v666_v25, %v661_v23 }
 0x501   :  { %v671_v31 = vmul.f32 0.2, %v667_v27  ;;  %v672_v32 = vmul.f32 0.2, %v668_v28  ;;  %vm669_vm5 = vcmp.ge.f32.partialorder %v667_v27, 0.0  ;;  %vm670_vm6 = vcmp.ge.f32.partialorder %v668_v28, 0.0 }
 0x503   :  { %v673_v34 = vsel %vm669_vm5, %v667_v27, %v671_v31  ;;  %v674_v35 = vsel %vm670_vm6, %v668_v28, %v672_v32 }
 0x504   :  { %v675_v36 = vadd.f32 %v673_v34, %v2467_v41  ;;  %v676_v30 = vadd.f32 %v674_v35, %v2472_v43 }
 0x506   :  { %v677_v37 = vsel %vm346_vm4, %v675_v36, -inf  ;;  %v680_v29 = vsel %vm346_vm4, %v676_v30, -inf }
 0x507   :  { %678 = vmax.xlane.f32.xlu0 %v677_v37 }
 0x50b   :  { %681 = vmax.xlane.f32.xlu0 %v680_v29 }
 0x594   :  { %v679_v38 = vpop.xlane.xlu0 %678 }
 0x595   :  { %v683_v39 = vsub.f32 %v675_v36, %v679_v38 }
 0x597   :  { %v685_v40 = vmul.f32 1.442695, %v683_v39 }
 0x598   :  { %v682_v42 = vpop.xlane.xlu0 %681 }
 0x599   :  { %2293 = vpow2.f32 %v685_v40  ;;  %v684_v44 = vsub.f32 %v676_v30, %v682_v42 }
 0x59b   :  { %v687_v45 = vmul.f32 1.442695, %v684_v44 }
 0x59d   :  { %2295 = vpow2.f32 %v687_v45 }
 0x5a3   :  { %v2294_v46 = vpop.eup %2293 }
 0x5a4   :  { %v689_v47 = vsel %vm346_vm4, %v2294_v46, 0.0 }
 0x5a5   :  { %690 = vadd.xlane.f32.xlu0 %v689_v47  ;;  %v1933_v47 = vld [vmem:[%s2690_s3 + $0x60] sm:$0xff] }
 0x5a7   :  { %v2296_v48 = vpop.eup %2295 }
 0x5a8   :  { %v692_v49 = vsel %vm346_vm4, %v2296_v48, 0.0 }
 0x5a9   :  { %693 = vadd.xlane.f32.xlu0 %v692_v49 }
 0x632   :  { %v691_v53 = vpop.xlane.xlu0 %690 }
 0x633   :  { %2297 = vrcp.f32 %v691_v53 }
 0x636   :  { %v694_v54 = vpop.xlane.xlu0 %693 }
 0x637   :  { %2299 = vrcp.f32 %v694_v54  ;;  %v1935_v54 = vld [vmem:[%s2690_s3 + $0x70] sm:$0xff] }
 0x63d   :  { %v2298_v55 = vpop.eup %2297 }
 0x63e   :  { %v697_v56 = vmul.f32 %v2298_v55, %v2294_v46  ;;  %v1936_v55 = vld [vmem:[%s2690_s3 + $0x78] sm:$0xff] }
 0x63f   :  { %v2261_v58 = vpack.c.bf16 %v1936_v55, %v1935_v54 }
 0x640   :  { %2100 = vmatprep.mubr.msk.f32.mxu0 %vm346_vm4, %v697_v56 }
 0x641   :  { %v2300_v59 = vpop.eup %2299 }
 0x642   :  { %v698_v60 = vmul.f32 %v2300_v59, %v2296_v48  ;;  %v1934_v48 = vld [vmem:[%s2690_s3 + $0x68] sm:$0xff]  ;;  %v1928_v59 = vld [vmem:[%s2693_s4 + $0x2] ss:$0 sm:$0xff] }
 0x643   :  { %v2257_v49 = vpack.c.bf16 %v1934_v48, %v1933_v47  ;;  %v1945_v48 = vld [vmem:[%s2696_s5] ss:$0 sm:$0xff] }
 0x644   :  { %2101 = vmatmul.mubr.msk.f32.vlgmr.msra.gmra.mrb[6].mxu0 %vm346_vm4, %v698_v60 }
 0x645   :  { %2240 = vmatpush3.bf16.msra.mxu0 %v2237_v52  ;;  %2122 = vmatprep.mubr.msk.f32.mxu0 %vm133_vm1, %v2435_v21 }
 0x646   :  { %2242 = vmatprep.subr.bf16.mxu0 %v2241_v61  ;;  %2258 = vmatprep.subr.bf16.mxu1 %v2257_v49 }
 0x649   :  { %2244 = vmatpush3.bf16.msra.mxu0 %v2241_v61 }
 0x64a   :  { %2250 = vmatprep.subr.bf16.mxu0 %v2249_v0 }
 0x64c   :  { %2123 = vmatmul.mubr.msk.f32.vlgmr.msra.gmra.mrb[8].mxu0 %vm133_vm1, %v2433_v20 }
 0x64d   :  { %2252 = vmatpush3.bf16.msra.mxu0 %v2249_v0  ;;  %2140 = vmatprep.mubr.msk.f32.mxu0 %vm133_vm1, %v2435_v21 }
 0x64e   :  { %2254 = vmatprep.subr.bf16.mxu0 %v2253_v3 }
 0x651   :  { %2256 = vmatpush3.bf16.msra.mxu0 %v2253_v3 }
 0x652   :  { %2266 = vmatprep.subr.bf16.mxu0 %v2439_v22 }
 0x654   :  { %2141 = vmatmul.mubr.msk.f32.vlgmr.msra.gmra.mrb[10].mxu0 %vm133_vm1, %v2433_v20 }
 0x655   :  { %2268 = vmatpush3.bf16.msra.mxu0 %v2439_v22 }
 0x717   :  { %v2102_v6 = vpop.f32.mrb[6].mxu0 }
 0x718   :  { %v789_v8 = vmul.f32 %v2102_v6, %v1912_v5  ;;  %v771_v9 = vpop.f32.mrb[7].mxu0 }
 0x719   :  { %v788_v11 = vmul.f32 %v1912_v5, %v771_v9 }
 0x71a   :  { %v2577_v12 = vadd.f32 %v789_v8, %v458_v7 }
 0x71b   :  { %v2579_v13 = vadd.f32 %v788_v11, %v457_v10 }
 0x71f   :  { %v2124_v22 = vpop.f32.mrb[8].mxu0 }
 0x720   :  { %991 = vperm.xlu0 %2283, %v2124_v22   ;;  %v943_v16 = vpop.f32.mrb[9].mxu0 }
 0x721   :  { %986 = vperm.xlu1 %2284, %v943_v16  }
 0x727   :  { %v2581_v17 = vpop.f32.mrb[10].mxu0 }
 0x728   :  { %v2583_v23 = vpop.f32.mrb[11].mxu0 }
 0x73e   :  { %952 = vxpose.xlu0.b32.start [1/2] (short) (narrow) %v2522_v19, 8 }
 0x742   :  { %953 = vxpose.xlu0.b32.end [2/2] (short) (narrow) %v2520_v18, 8 }
 0x79f   :  { %v992_v14 = vpop.permute.xlu0 %991 }
 0x7a0   :  { %v987_v25 = vpop.permute.xlu1 %986 }
 0x7be   :  { %v968_v24 = vpop.trf.xlu0 }
 0x7bf   :  { %v997_v15 = vrot.slane %v968_v24, %v2461_v33 }
 0x7c1   :  { %v998_v26 = vadd.f32 %v997_v15, %v987_v25  ;;  %v999_v27 = vadd.f32 %v997_v15, %v992_v14 }
 0x7c3   :  { %v1002_v28 = vmul.f32 0.2, %v998_v26  ;;  %v1003_v31 = vmul.f32 0.2, %v999_v27  ;;  %vm1001_vm7 = vcmp.ge.f32.partialorder %v999_v27, 0.0  ;;  %vm1000_vm8 = vcmp.ge.f32.partialorder %v998_v26, 0.0 }
 0x7c5   :  { %v1005_v32 = vsel %vm1001_vm7, %v999_v27, %v1003_v31  ;;  %v1004_v34 = vsel %vm1000_vm8, %v998_v26, %v1002_v28 }
 0x7c6   :  { %v1007_v35 = vadd.f32 %v1005_v32, %v2472_v43  ;;  %v1006_v36 = vadd.f32 %v1004_v34, %v2467_v41 }
 0x7c8   :  { %v1011_v19 = vsel %vm346_vm4, %v1007_v35, -inf  ;;  %v1008_v18 = vsel %vm346_vm4, %v1006_v36, -inf }
 0x7c9   :  { %1012 = vmax.xlane.f32.xlu0 %v1011_v19  ;;  %1009 = vmax.xlane.f32.xlu1 %v1008_v18 }
 0x856   :  { %v1013_v37 = vpop.xlane.xlu0 %1012  ;;  %v1010_v30 = vpop.xlane.xlu1 %1009 }
 0x857   :  { %v1015_v29 = vsub.f32 %v1007_v35, %v1013_v37  ;;  %v1014_v38 = vsub.f32 %v1006_v36, %v1010_v30  ;;  %v1465_v37 = vld [vmem:[%s2694_s6] sm:$0xff]  ;;  %v1466_v30 = vld [vmem:[%s2694_s6 + $0x8] sm:$0xff] }
 0x859   :  { %v1016_v39 = vmul.f32 1.442695, %v1014_v38  ;;  %v1018_v40 = vmul.f32 1.442695, %v1015_v29  ;;  %v2269_v29 = vpack.c.bf16 %v1466_v30, %v1465_v37  ;;  %v1467_v38 = vld [vmem:[%s2694_s6 + $0x10] sm:$0xff] }
 0x85b   :  { %2301 = vpow2.f32 %v1016_v39  ;;  %v1468_v39 = vld [vmem:[%s2694_s6 + $0x18] sm:$0xff] }
 0x85c   :  { %2303 = vpow2.f32 %v1018_v40  ;;  %v2273_v40 = vpack.c.bf16 %v1468_v39, %v1467_v38 }
 0x865   :  { %v2302_v42 = vpop.eup %2301 }
 0x866   :  { %v1020_v44 = vsel %vm346_vm4, %v2302_v42, 0.0  ;;  %v2304_v45 = vpop.eup %2303 }
 0x867   :  { %1021 = vadd.xlane.f32.xlu1 %v1020_v44  ;;  %v1023_v46 = vsel %vm346_vm4, %v2304_v45, 0.0  ;;  %v1944_v44 = vld [vmem:[%s2693_s4 + $0x3] ss:$0 sm:$0xff] }
 0x86b   :  { %1024 = vadd.xlane.f32.xlu1 %v1023_v46 }
 0x8f4   :  { %v1022_v50 = vpop.xlane.xlu1 %1021 }
 0x8f5   :  { %2305 = vrcp.f32 %v1022_v50 }
 0x8f8   :  { %v1025_v51 = vpop.xlane.xlu1 %1024 }
 0x8f9   :  { %2307 = vrcp.f32 %v1025_v51 }
 0x8ff   :  { %v2306_v52 = vpop.eup %2305 }
 0x900   :  { %v1028_v53 = vmul.f32 %v2306_v52, %v2302_v42  ;;  %v1550_v42 = vld [vmem:[%s2695_s7] sm:$0xf] }
 0x901   :  { %2172 = vmatprep.subr.msk.mxu0 %vm1559_vm11, %v1550_v42 }
 0x902   :  { %2129 = vmatprep.mubr.msk.f32.mxu1 %vm346_vm4, %v1028_v53 }
 0x903   :  { %v2308_v56 = vpop.eup %2307 }
 0x904   :  { %v1029_v57 = vmul.f32 %v2308_v56, %v2304_v45  ;;  %v1551_v56 = vld [vmem:[%s2697_s8] sm:$0xf] }
 0x906   :  { %2130 = vmatmul.mubr.msk.f32.vlgmr.msra.gmra.mrb[8].mxu1 %vm346_vm4, %v1029_v57 }
 0x907   :  { %2260 = vmatpush3.bf16.msra.mxu1 %v2257_v49  ;;  %2151 = vmatprep.mubr.msk.f32.mxu1 %vm133_vm1, %v2435_v21 }
 0x908   :  { %2262 = vmatprep.subr.bf16.mxu1 %v2261_v58 }
 0x90b   :  { %2264 = vmatpush3.bf16.msra.mxu1 %v2261_v58 }
 0x90c   :  { %2270 = vmatprep.subr.bf16.mxu1 %v2269_v29 }
 0x90e   :  { %2152 = vmatmul.mubr.msk.f32.vlgmr.msra.gmra.mrb[10].mxu1 %vm133_vm1, %v2433_v20 }
 0x90f   :  { %2272 = vmatpush3.bf16.msra.mxu1 %v2269_v29 }
 0x910   :  { %2274 = vmatprep.subr.bf16.mxu1 %v2273_v40 }
 0x913   :  { %2276 = vmatpush3.bf16.msra.mxu1 %v2273_v40 }
 0x9d9   :  { %v2131_v60 = vpop.f32.mrb[8].mxu1 }
 0x9da   :  { %v1120_v61 = vmul.f32 %v2131_v60, %v1928_v59  ;;  %v1102_v62 = vpop.f32.mrb[9].mxu1 }
 0x9db   :  { %v1119_v63 = vmul.f32 %v1928_v59, %v1102_v62 }
 0x9dc   :  { %v2616_v0 = vadd.f32 %v1120_v61, %v2577_v12 }
 0x9dd   :  { %v2619_v1 = vadd.f32 %v1119_v63, %v2579_v13 }
 0x9e1   :  { %v2153_v21 = vpop.f32.mrb[10].mxu1 }
 0x9e2   :  { %1322 = vperm.xlu1 %2284, %v2153_v21   ;;  %v1274_v2 = vpop.f32.mrb[11].mxu1 }
 0x9e6   :  { %1317 = vperm.xlu1 %2284, %v1274_v2  }
 0xa0f   :  { %1283 = vxpose.xlu1.b32.start [1/2] (short) (narrow) %v2583_v23, 8 }
 0xa13   :  { %1284 = vxpose.xlu1.b32.end [2/2] (short) (narrow) %v2581_v17, 8 }
 0xa61   :  { %v1323_v20 = vpop.permute.xlu1 %1322 }
 0xa65   :  { %v1318_v3 = vpop.permute.xlu1 %1317 }
 0xa8f   :  { %v1299_v4 = vpop.trf.xlu1 }
 0xa90   :  { %v1328_v5 = vrot.slane %v1299_v4, %v2461_v33 }
 0xa92   :  { %v1329_v6 = vadd.f32 %v1328_v5, %v1318_v3  ;;  %v1330_v7 = vadd.f32 %v1328_v5, %v1323_v20 }
 0xa94   :  { %v1333_v8 = vmul.f32 0.2, %v1329_v6  ;;  %v1334_v9 = vmul.f32 0.2, %v1330_v7  ;;  %vm1331_vm9 = vcmp.ge.f32.partialorder %v1329_v6, 0.0  ;;  %vm1332_vm10 = vcmp.ge.f32.partialorder %v1330_v7, 0.0 }
 0xa96   :  { %v1335_v10 = vsel %vm1331_vm9, %v1329_v6, %v1333_v8  ;;  %v1336_v11 = vsel %vm1332_vm10, %v1330_v7, %v1334_v9 }
 0xa97   :  { %v1337_v12 = vadd.f32 %v1335_v10, %v2467_v41  ;;  %v1338_v22 = vadd.f32 %v1336_v11, %v2472_v43 }
 0xa99   :  { %v1339_v13 = vsel %vm346_vm4, %v1337_v12, -inf  ;;  %v1342_v16 = vsel %vm346_vm4, %v1338_v22, -inf }
 0xa9a   :  { %1340 = vmax.xlane.f32.xlu0 %v1339_v13 }
 0xa9e   :  { %1343 = vmax.xlane.f32.xlu0 %v1342_v16 }
 0xb27   :  { %v1341_v17 = vpop.xlane.xlu0 %1340 }
 0xb28   :  { %v1345_v23 = vsub.f32 %v1337_v12, %v1341_v17 }
 0xb2a   :  { %v1347_v14 = vmul.f32 1.442695, %v1345_v23 }
 0xb2b   :  { %v1344_v24 = vpop.xlane.xlu0 %1343 }
 0xb2c   :  { %2309 = vpow2.f32 %v1347_v14  ;;  %v1346_v15 = vsub.f32 %v1338_v22, %v1344_v24 }
 0xb2e   :  { %v1349_v25 = vmul.f32 1.442695, %v1346_v15 }
 0xb30   :  { %2311 = vpow2.f32 %v1349_v25 }
 0xb36   :  { %v2310_v26 = vpop.eup %2309 }
 0xb37   :  { %v1351_v27 = vsel %vm346_vm4, %v2310_v26, 0.0 }
 0xb38   :  { %1352 = vadd.xlane.f32.xlu0 %v1351_v27 }
 0xb3a   :  { %v2312_v28 = vpop.eup %2311 }
 0xb3b   :  { %v1354_v31 = vsel %vm346_vm4, %v2312_v28, 0.0 }
 0xb3c   :  { %1355 = vadd.xlane.f32.xlu0 %v1354_v31  ;;  %v1954_v31 = vld [vmem:[%s2698_s9] ss:$0 sm:$0xff] }
 0xbc5   :  { %v1353_v32 = vpop.xlane.xlu0 %1352 }
 0xbc6   :  { %2313 = vrcp.f32 %v1353_v32 }
 0xbc9   :  { %v1356_v34 = vpop.xlane.xlu0 %1355 }
 0xbca   :  { %2315 = vrcp.f32 %v1356_v34 }
 0xbd0   :  { %v2314_v35 = vpop.eup %2313 }
 0xbd1   :  { %v1359_v36 = vmul.f32 %v2314_v35, %v2310_v26 }
 0xbd3   :  { %2158 = vmatprep.mubr.msk.f32.mxu0 %vm346_vm4, %v1359_v36 }
 0xbd4   :  { %v2316_v19 = vpop.eup %2315 }
 0xbd5   :  { %v1360_v18 = vmul.f32 %v2316_v19, %v2312_v28 }
 0xbd7   :  { %2159 = vmatmul.mubr.msk.f32.vlgmr.msra.gmra.mrb[12].mxu0 %vm346_vm4, %v1360_v18 }
 0xbd8   :  { %2173 = vmatpush3.msk.msra.mxu0 %vm1559_vm11, %v1550_v42 }
 0xbd9   :  { %2177 = vmatprep.subr.msk.mxu0 %vm1559_vm11, %v1551_v56 }
 0xcaa   :  { %v2160_v45 = vpop.f32.mrb[12].mxu0 }
 0xcab   :  { %v1451_v46 = vmul.f32 %v2160_v45, %v1944_v44  ;;  %v1433_v47 = vpop.f32.mrb[13].mxu0 }
 0xcac   :  { %v1450_v49 = vmul.f32 %v1944_v44, %v1433_v47 }
 0xcad   :  { %v1453_v50 = vadd.f32 %v1451_v46, %v2616_v0 }
 0xcae   :  { %v1452_v51 = vadd.f32 %v1450_v49, %v2619_v1 }
 0xcaf   :  { %v1462_v52 = vadd.f32 %v1945_v48, %v1453_v50 }
 0xcb0   :  { %v1461_v53 = vadd.f32 %v1945_v48, %v1452_v51 }
 0xcb1   :  { %v1464_v55 = vmax.f32 %v1462_v52, 0.0 }
 0xcb2   :  { %v1463_v54 = vmax.f32 %v1461_v53, 0.0 }
 0xcb4   :  { %2169 = vmatprep.mubr.msk.f32.mxu1 %vm133_vm1, %v1463_v54 }
 0xcb5   :  { %2170 = vmatmul.mubr.msk.f32.vlgmr.msra.gmra.mrb[12].mxu1 %vm133_vm1, %v1464_v55 }
 0xd88   :  { %v2171_v57 = vpop.f32.mrb[12].mxu1 }
 0xd89   :  { %v1541_v58 = vpop.f32.mrb[13].mxu1 }
 0xd8a   :  { %v2277_v59 = vpack.c.bf16 %v2171_v57, %v1541_v58  ;;  %2174 = vmatprep.mubr.msk.f32.mxu0 %vm1552_vm12, %v1541_v58 }
 0xd8b   :  { %2175 = vmatmul.mubr.msk.f32.vlgmr.msra.gmra.mrb[14].mxu0 %vm1552_vm12, %v2171_v57 }
 0xd8c   :  { %2178 = vmatpush3.msk.msra.mxu0 %vm1559_vm11, %v1551_v56  ;;  %2179 = vmatprep.mubr.msk.f32.mxu0 %vm1552_vm12, %v1541_v58 }
 0xd8d   :  { %2278 = vmatprep.subr.bf16.mxu1 %v2277_v59 }
 0xd8e   :  { %2280 = vmatpush3.bf16.msra.mxu1 %v2277_v59 }
 0xd8f   :  { %2180 = vmatmul.mubr.msk.f32.vlgmr.msra.gmra.mrb[16].mxu0 %vm1552_vm12, %v2171_v57 }
 0xe5e   :  { %v2176_v60 = vpop.f32.mrb[14].mxu0 }
 0xe5f   :  { %v1629_v61 = vpop.f32.mrb[15].mxu0 }
 0xe62   :  { %v2181_v62 = vpop.f32.mrb[16].mxu0 }
 0xe63   :  { %1755 = vperm.xlu1 %2284, %v2181_v62   ;;  %v1707_v63 = vpop.f32.mrb[17].mxu0 }
 0xe64   :  { %1750 = vperm.xlu0 %2283, %v1707_v63  }
 0xe82   :  { %1716 = vxpose.xlu0.b32.start [1/2] (short) (narrow) %v1629_v61, 8 }
 0xe86   :  { %1717 = vxpose.xlu0.b32.end [2/2] (short) (narrow) %v2176_v60, 8 }
 0xee2   :  { %v1756_v2 = vpop.permute.xlu1 %1755 }
 0xee3   :  { %v1751_v0 = vpop.permute.xlu0 %1750 }
 0xf02   :  { %v1732_v1 = vpop.trf.xlu0 }
 0xf03   :  { %v1761_v21 = vrot.slane %v1732_v1, %v2461_v33 }
 0xf05   :  { %v1762_v20 = vadd.f32 %v1761_v21, %v1751_v0  ;;  %v1763_v3 = vadd.f32 %v1761_v21, %v1756_v2 }
 0xf07   :  { %v1766_v4 = vmul.f32 0.2, %v1762_v20  ;;  %v1767_v5 = vmul.f32 0.2, %v1763_v3  ;;  %vm1765_vm13 = vcmp.ge.f32.partialorder %v1763_v3, 0.0  ;;  %vm1764_vm14 = vcmp.ge.f32.partialorder %v1762_v20, 0.0 }
 0xf09   :  { %v1769_v6 = vsel %vm1765_vm13, %v1763_v3, %v1767_v5  ;;  %v1768_v7 = vsel %vm1764_vm14, %v1762_v20, %v1766_v4 }
 0xf0a   :  { %v1771_v8 = vadd.f32 %v1769_v6, %v2472_v43  ;;  %v1770_v9 = vadd.f32 %v1768_v7, %v2467_v41 }
 0xf0c   :  { %v1775_v10 = vsel %vm346_vm4, %v1771_v8, -inf  ;;  %v1772_v11 = vsel %vm346_vm4, %v1770_v9, -inf }
 0xf0d   :  { %1776 = vmax.xlane.f32.xlu0 %v1775_v10  ;;  %1773 = vmax.xlane.f32.xlu1 %v1772_v11 }
 0xf9a   :  { %v1777_v33 = vpop.xlane.xlu0 %1776  ;;  %v1774_v12 = vpop.xlane.xlu1 %1773 }
 0xf9b   :  { %v1779_v13 = vsub.f32 %v1771_v8, %v1777_v33  ;;  %v1778_v22 = vsub.f32 %v1770_v9, %v1774_v12 }
 0xf9d   :  { %v1780_v16 = vmul.f32 1.442695, %v1778_v22  ;;  %v1782_v17 = vmul.f32 1.442695, %v1779_v13 }
 0xf9f   :  { %2317 = vpow2.f32 %v1780_v16 }
 0xfa0   :  { %2319 = vpow2.f32 %v1782_v17 }
 0xfa9   :  { %v2318_v23 = vpop.eup %2317 }
 0xfaa   :  { %v1784_v14 = vsel %vm346_vm4, %v2318_v23, 0.0  ;;  %v2320_v43 = vpop.eup %2319 }
 0xfab   :  { %1785 = vadd.xlane.f32.xlu1 %v1784_v14  ;;  %v1787_v41 = vsel %vm346_vm4, %v2320_v43, 0.0 }
 0xfaf   :  { %1788 = vadd.xlane.f32.xlu1 %v1787_v41 }
0x1038   :  { %v1786_v24 = vpop.xlane.xlu1 %1785 }
0x1039   :  { %2321 = vrcp.f32 %v1786_v24 }
0x103c   :  { %v1789_v15 = vpop.xlane.xlu1 %1788 }
0x103d   :  { %2323 = vrcp.f32 %v1789_v15 }
0x1043   :  { %v2322_v25 = vpop.eup %2321 }
0x1044   :  { %v1792_v26 = vmul.f32 %v2322_v25, %v2318_v23 }
0x1046   :  { %2186 = vmatprep.mubr.msk.f32.mxu1 %vm346_vm4, %v1792_v26 }
0x1047   :  { %v2324_v27 = vpop.eup %2323 }
0x1048   :  { %v1793_v28 = vmul.f32 %v2324_v27, %v2320_v43 }
0x104a   :  { %2187 = vmatmul.mubr.msk.f32.vlgmr.msra.gmra.mrb[14].mxu1 %vm346_vm4, %v1793_v28 }
0x111d   :  { %v2188_v32 = vpop.f32.mrb[14].mxu1 }
0x111e   :  { %v1879_v34 = vadd.f32 %v2188_v32, %v1954_v31  ;;  %v1873_v35 = vpop.f32.mrb[15].mxu1 }
0x111f   :  { %v1874_v36 = vadd.f32 %v1954_v31, %v1873_v35 }
0x1120   :  { %1883 = vst.msk [vmem:[%s2699_s11 + $0x8] sm:$0xff] %vm1552_vm12, %v1879_v34 }
0x1121   :  { %1882 = vst.msk [vmem:[%s2699_s11] sm:$0xff] %vm1552_vm12, %v1874_v36 }

</bundles_post_ra>
